<compile_context>
chip_gen: v6e
topology: v6e:2x2x1
jax: 0.10.0
libtpu: 0.0.40
codegen_flags: <defaults>
</compile_context>

<pallas_src>
import functools

import jax
import jax.numpy as jnp
from jax.experimental import pallas as pl
from jax.experimental.pallas import tpu as pltpu


def _round_up(x, m):
    return (x + m - 1) // m * m


def _vmem_config():
    """Returns (per-input block budget in f32 elements, vmem_limit_bytes)."""
    kind = ""
    try:
        kind = jax.devices()[0].device_kind.lower()
    except Exception:
        pass
    if "v5" in kind or "v6" in kind:
        # 128 MiB physical VMEM: ~6 MiB per input block, generous limit.
        return (3 << 20) // 2, 96 * 1024 * 1024
    # v7x (64 MiB physical VMEM) or unknown: stay conservative.
    return 1 << 20, 48 * 1024 * 1024


def _choose_hw_block(hw, max_hw_blk):
    """Pick an HW tile that avoids wrapper-side padding whenever possible."""
    max_hw_blk = max(128, max_hw_blk // 128 * 128)
    if hw % 128 == 0:
        base = hw // 128
        best = 1
        for m in range(1, min(base, max_hw_blk // 128) + 1):
            if base % m == 0:
                best = m
        return best * 128, hw
    if hw <= max_hw_blk:
        # Full-extent block is legal even when hw is not a lane multiple.
        return hw, hw
    # Rare fallback: pad (costs one extra HBM copy in the wrapper).
    return max_hw_blk, _round_up(hw, max_hw_blk)


def _choose_row_block(nc, row_align, max_rows):
    """Prefer exact divisors (no padding); prefer >=2 tiles (megacore)."""
    max_rows = max(row_align, max_rows // row_align * row_align)
    cands = [b for b in range(row_align, min(nc, max_rows) + 1, row_align)
             if nc % b == 0]
    multi = [b for b in cands if nc // b >= 2]
    if multi:
        return max(multi), nc
    if cands:
        return max(cands), nc
    if nc <= max_rows:
        # Full-extent block is legal even when nc is not a sublane multiple.
        return nc, nc
    # Rare fallback: balanced tiling with minimal padding.
    num_tiles = -(-nc // max_rows)
    blk = _round_up(-(-nc // num_tiles), row_align)
    return blk, _round_up(nc, blk)


def _lane_fold(v):
    """(TR, BW) -> (TR, 128) partial sums using lane-aligned VALU adds only."""
    tr, bw = v.shape
    if bw % 128 != 0:
        # Only reachable when blk_hw == HW and HW is not a lane multiple.
        s = jnp.sum(v, axis=1, keepdims=True)
        lane = jax.lax.broadcasted_iota(jnp.int32, (tr, 128), 1)
        return jnp.where(lane == 0, s, 0.0)
    slabs = [v[:, g * 128:(g + 1) * 128] for g in range(bw // 128)]
    while len(slabs) > 1:  # pairwise tree: short dep chains, VALU only
        nxt = [slabs[a] + slabs[a + 1] for a in range(0, len(slabs) - 1, 2)]
        if len(slabs) % 2:
            nxt.append(slabs[-1])
        slabs = nxt
    return slabs[0]


def _stats_kernel(x_ref, t_ref, stats_ref,
                  acc_bce, acc_int, acc_uni, acc_nz,
                  *, hw, blk_hw, mask_last, binary_target):
    """Per-row (= per (n, c)) spatial reductions, accumulated over HW tiles.

    x_ref / t_ref : (TR, blk_hw) input tiles (any float dtype; cast to f32)
    stats_ref     : (TR, 128) f32 lane-dense slab written on the last HW step:
                    lane 0 = sum t*log(p) + (1-t)*log(1-p)
                    lane 1 = sum pred * t
                    lane 2 = sum pred + t        (or sum pred, binary path)
                    lane 3 = count_nonzero(t)    (or sum t,   binary path)
    acc_*         : (TR, 128) f32 per-lane accumulators (persist across steps)
    """
    j = pl.program_id(1)
    nj = pl.num_programs(1)

    @pl.when(j == 0)
    def _():
        acc_bce[...] = jnp.zeros_like(acc_bce)
        acc_int[...] = jnp.zeros_like(acc_int)
        acc_uni[...] = jnp.zeros_like(acc_uni)
        acc_nz[...] = jnp.zeros_like(acc_nz)

    x = x_ref[...].astype(jnp.float32)
    t = t_ref[...].astype(jnp.float32)

    eps = 1e-07
    clamped = jnp.clip(x, eps, 1.0 - eps)
    # NOTE: the reference's clamp(log, min=-100) is dead code given the clip
    # above (log >= ~-16.12), so it is dropped here.
    if binary_target:
        # Exact only for t in {0, 1}: one EUP log instead of two.
        bce = jnp.log(jnp.where(t >= 0.5, clamped, 1.0 - clamped))
        pred = (x >= 0.5).astype(jnp.float32)
        acc_int[...] += _lane_fold(pred * t)
        acc_uni[...] += _lane_fold(pred)   # union = sum(pred) + sum(t), later
        acc_nz[...] += _lane_fold(t)       # count_nonzero(t) == sum(t)
    else:
        bce = t * jnp.log(clamped) + (1.0 - t) * jnp.log(1.0 - clamped)
        pred = jnp.round(x)
        acc_int[...] += _lane_fold(pred * t)
        acc_uni[...] += _lane_fold(pred + t)
        acc_nz[...] += _lane_fold((t != 0.0).astype(jnp.float32))

    if mask_last:
        # Zero-padded spatial columns only exist in the last HW tile.  They
        # contribute nothing to inter/union/nz (pred=0, t=0) but
        # log(1 - eps) != 0, so mask the BCE exactly there only.
        @pl.when(j == nj - 1)
        def _():
            col = j * blk_hw + jax.lax.broadcasted_iota(jnp.int32, bce.shape, 1)
            acc_bce[...] += _lane_fold(jnp.where(col < hw, bce, 0.0))

        @pl.when(j < nj - 1)
        def _():
            acc_bce[...] += _lane_fold(bce)
    else:
        acc_bce[...] += _lane_fold(bce)

    @pl.when(j == nj - 1)
    def _():
        # Single cross-lane (XLU) reduction per row tile, in the epilogue.
        lane = jax.lax.broadcasted_iota(jnp.int32, stats_ref.shape, 1)
        out = jnp.where(lane == 0,
                        jnp.sum(acc_bce[...], axis=1, keepdims=True), 0.0)
        out = jnp.where(lane == 1,
                        jnp.sum(acc_int[...], axis=1, keepdims=True), out)
        out = jnp.where(lane == 2,
                        jnp.sum(acc_uni[...], axis=1, keepdims=True), out)
        out = jnp.where(lane == 3,
                        jnp.sum(acc_nz[...], axis=1, keepdims=True), out)
        stats_ref[...] = out


@functools.partial(jax.jit, static_argnames=("weights", "smooth", "alpha",
                                             "assume_binary_target"))
def weighted_bce_dice_loss(output, target, *, alpha=0.5, weights=(1.0, 1.0),
                           smooth=1e-07, assume_binary_target=False):
    """weighted BCE + Dice loss.  Pass bf16 inputs on v5e for ~2x HBM saving;
    the kernel upcasts to f32 internally."""
    del alpha  # unused in the reference forward()
    N, C, H, W = output.shape
    # The reference multiplies a (N,) weight vector against a (N, C) loss,
    # which only broadcasts (torch and numpy alike) when this holds:
    assert C == 1 or N == C or N == 1, (
        "loss_weights (N,) must broadcast against (N, C), as in the "
        "reference PyTorch forward()")
    NC, HW = N * C, H * W

    x2 = output.reshape(NC, HW)
    t2 = target.reshape(NC, HW)

    itemsize = jnp.dtype(x2.dtype).itemsize
    # sublane alignment for the input tiles: 8 (f32) / 16 (bf16) / 32 (int8)
    row_align = max(8, 32 // max(itemsize, 1))

    budget_elems, vmem_limit = _vmem_config()

    blk_hw, hw_pad = _choose_hw_block(HW, budget_elems // row_align)
    max_rows = min(1024, max(row_align, budget_elems // max(blk_hw, 1)))
    blk_rows, nc_pad = _choose_row_block(NC, row_align, max_rows)

    if nc_pad != NC or hw_pad != HW:
        # Rare fallback for awkward shapes; costs one extra HBM copy.
        x2 = jnp.pad(x2, ((0, nc_pad - NC), (0, hw_pad - HW)))
        t2 = jnp.pad(t2, ((0, nc_pad - NC), (0, hw_pad - HW)))

    grid = (nc_pad // blk_rows, hw_pad // blk_hw)
    in_spec = pl.BlockSpec((blk_rows, blk_hw), lambda i, j: (i, j))
    out_spec = pl.BlockSpec((blk_rows, 128), lambda i, j: (i, 0))

    kernel = functools.partial(_stats_kernel, hw=HW, blk_hw=blk_hw,
                               mask_last=(hw_pad != HW),
                               binary_target=assume_binary_target)

    cost = pl.CostEstimate(
        flops=12 * nc_pad * hw_pad,
        transcendentals=(1 if assume_binary_target else 2) * nc_pad * hw_pad,
        bytes_accessed=2 * nc_pad * hw_pad * itemsize + nc_pad * 128 * 4)

    stats = pl.pallas_call(
        kernel,
        out_shape=jax.ShapeDtypeStruct((nc_pad, 128), jnp.float32),
        grid_spec=pltpu.PrefetchScalarGridSpec(
            num_scalar_prefetch=0,
            grid=grid,
            in_specs=[in_spec, in_spec],
            out_specs=out_spec,
            scratch_shapes=[pltpu.VMEM((blk_rows, 128), jnp.float32)] * 4,
        ),
        compiler_params=pltpu.CompilerParams(
            dimension_semantics=("parallel", "arbitrary"),
            vmem_limit_bytes=vmem_limit),
        cost_estimate=cost,
    )(x2, t2)

    # ---- tiny per-(N, C) finalization (glue), padded rows sliced off ----
    stats = stats[:NC, :4]
    bce_sum = stats[:, 0].reshape(N, C)
    inter = stats[:, 1].reshape(N, C)
    s2 = stats[:, 2].reshape(N, C)
    s3 = stats[:, 3].reshape(N, C)

    if assume_binary_target:
        union = s2 + s3        # sum(pred) + sum(t)
        nz = s3                # sum(t) == count_nonzero(t) for binary masks
    else:
        union = s2             # sum(pred + t)
        nz = s3                # count_nonzero(t)

    loss1 = -(bce_sum / float(HW))                                   # (N, C)
    loss2 = 1.0 - (2.0 * inter + smooth) / (union + smooth)          # (N, C)

    # count_nonzero over (1, 2, 3), clamped to max=1 -> 0/1 label per sample
    nz_per_sample = jnp.sum(nz, axis=1)
    target_labels = (nz_per_sample > 0).astype(jnp.int32)

    w = jnp.asarray(weights, dtype=jnp.float32)
    loss_weights = w[target_labels]                                  # (N,)

    # Reproduce torch's broadcast: (N,) * (N, C)
    total = loss_weights * (loss1 + loss2)
    return jnp.mean(total)


def _reference_loss(output, target, *, weights=(1.0, 1.0), smooth=1e-07):
    """Pure-JAX transcription of the PyTorch forward, for verification."""
    clamped = jnp.clip(output, 1e-07, 1.0 - 1e-07)
    log0 = jnp.maximum(jnp.log(clamped), -100.0)
    log1 = jnp.maximum(jnp.log(1.0 - clamped), -100.0)
    loss1 = -jnp.mean(target * log0 + (1.0 - target) * log1, axis=(2, 3))
    pred = jnp.round(output)
    intersection = jnp.sum(pred * target, axis=(2, 3))
    union = jnp.sum(pred + target, axis=(2, 3))
    loss2 = 1.0 - (2.0 * intersection + smooth) / (union + smooth)
    labels = jnp.minimum(jnp.count_nonzero(target, axis=(1, 2, 3)), 1)
    w = jnp.asarray(weights, dtype=jnp.float32)
    lw = w[labels]
    return jnp.mean(lw * (loss1 + loss2))


if __name__ == "__main__":
    key = jax.random.PRNGKey(0)
    k_out, k_tgt = jax.random.split(key)

    # N == C so the (N,) vs (N, C) broadcast in the reference forward is legal.
    N, C, H, W = 4, 4, 16, 16
    output = jax.random.uniform(k_out, (N, C, H, W), dtype=jnp.float32)
    target = jax.random.bernoulli(k_tgt, p=0.3, shape=(N, C, H, W)).astype(
        jnp.float32)
    # Make one sample an all-zero mask so the weights[target_labels] gather
    # exercises both entries.
    target = target.at[0].set(0.0)

    weights = (1.0, 2.0)  # constructor arg `weights`
    smooth = 1e-07        # constructor arg `smooth`

    ref = _reference_loss(output, target, weights=weights, smooth=smooth)

    # Default (exact) path.
    loss = weighted_bce_dice_loss(output, target, weights=weights,
                                  smooth=smooth)
    loss = jax.block_until_ready(loss)
    assert jnp.allclose(loss, ref, rtol=1e-5, atol=1e-6), (loss, ref)

    # Binary-target fast path (targets here are {0,1}, so it must also match).
    loss_b = weighted_bce_dice_loss(output, target, weights=weights,
                                    smooth=smooth, assume_binary_target=True)
    loss_b = jax.block_until_ready(loss_b)
    assert jnp.allclose(loss_b, ref, rtol=1e-5, atol=1e-6), (loss_b, ref)

    print("KERNEL_OK")
</pallas_src>

<mosaic_0001>
module attributes {stable_mosaic.version = 11 : i64} {
  func.func @_stats_kernel(%arg0: i32, %arg1: i32, %arg2: memref<8x256xf32, #tpu.memory_space<vmem>>, %arg3: memref<8x256xf32, #tpu.memory_space<vmem>>, %arg4: memref<8x128xf32, #tpu.memory_space<vmem>>, %arg5: memref<8x128xf32, #tpu.memory_space<vmem>>, %arg6: memref<8x128xf32, #tpu.memory_space<vmem>>, %arg7: memref<8x128xf32, #tpu.memory_space<vmem>>, %arg8: memref<8x128xf32, #tpu.memory_space<vmem>>) attributes {dimension_semantics = [#tpu.dimension_semantics<parallel>, #tpu.dimension_semantics<arbitrary>], iteration_bounds = array<i64: 2, 1>, scalar_prefetch = 0 : i64, scratch_operands = 4 : i64, tpu.core_type = #tpu.core_type<tc>, window_params = [{transform_indices = @transform_0, window_bounds = array<i64: 8, 256>}, {transform_indices = @transform_1, window_bounds = array<i64: 8, 256>}, {transform_indices = @transform_2, window_bounds = array<i64: 8, 128>}]} {
    %c0_i32 = arith.constant 0 : i32
    %0 = arith.cmpi eq, %arg1, %c0_i32 : i32
    %1 = arith.extui %0 : i1 to i32
    %c0_i32_0 = arith.constant 0 : i32
    %2 = arith.cmpi ne, %1, %c0_i32_0 : i32
    scf.if %2 {
      %cst_26 = arith.constant 0.000000e+00 : f32
      %52 = vector.broadcast %cst_26 : f32 to vector<8x128xf32>
      %c0_27 = arith.constant 0 : index
      %c0_28 = arith.constant 0 : index
      %53 = vector.load %arg5[%c0_27, %c0_28] : memref<8x128xf32, #tpu.memory_space<vmem>>, vector<8x128xf32>
      tpu.vector_store %arg5[%c0_27, %c0_28], %52 {strides = array<i32>} : memref<8x128xf32, #tpu.memory_space<vmem>>, vector<8x128xf32>,
      %cst_29 = arith.constant 0.000000e+00 : f32
      %54 = vector.broadcast %cst_29 : f32 to vector<8x128xf32>
      %c0_30 = arith.constant 0 : index
      %c0_31 = arith.constant 0 : index
      %55 = vector.load %arg6[%c0_30, %c0_31] : memref<8x128xf32, #tpu.memory_space<vmem>>, vector<8x128xf32>
      tpu.vector_store %arg6[%c0_30, %c0_31], %54 {strides = array<i32>} : memref<8x128xf32, #tpu.memory_space<vmem>>, vector<8x128xf32>,
      %cst_32 = arith.constant 0.000000e+00 : f32
      %56 = vector.broadcast %cst_32 : f32 to vector<8x128xf32>
      %c0_33 = arith.constant 0 : index
      %c0_34 = arith.constant 0 : index
      %57 = vector.load %arg7[%c0_33, %c0_34] : memref<8x128xf32, #tpu.memory_space<vmem>>, vector<8x128xf32>
      tpu.vector_store %arg7[%c0_33, %c0_34], %56 {strides = array<i32>} : memref<8x128xf32, #tpu.memory_space<vmem>>, vector<8x128xf32>,
      %cst_35 = arith.constant 0.000000e+00 : f32
      %58 = vector.broadcast %cst_35 : f32 to vector<8x128xf32>
      %c0_36 = arith.constant 0 : index
      %c0_37 = arith.constant 0 : index
      %59 = vector.load %arg8[%c0_36, %c0_37] : memref<8x128xf32, #tpu.memory_space<vmem>>, vector<8x128xf32>
      tpu.vector_store %arg8[%c0_36, %c0_37], %58 {strides = array<i32>} : memref<8x128xf32, #tpu.memory_space<vmem>>, vector<8x128xf32>,
    } else {
    }
    %c0 = arith.constant 0 : index
    %c0_1 = arith.constant 0 : index
    %3 = vector.load %arg2[%c0, %c0_1] : memref<8x256xf32, #tpu.memory_space<vmem>>, vector<8x256xf32>
    %c0_2 = arith.constant 0 : index
    %c0_3 = arith.constant 0 : index
    %4 = vector.load %arg3[%c0_2, %c0_3] : memref<8x256xf32, #tpu.memory_space<vmem>>, vector<8x256xf32>
    %cst = arith.constant 1.000000e-07 : f32
    %cst_4 = arith.constant 0.99999988 : f32
    %5 = vector.broadcast %cst : f32 to vector<8x256xf32>
    %6 = arith.maximumf %5, %3 : vector<8x256xf32>
    %7 = vector.broadcast %cst_4 : f32 to vector<8x256xf32>
    %8 = arith.minimumf %7, %6 : vector<8x256xf32>
    %9 = math.log %8 : vector<8x256xf32>
    %10 = arith.mulf %4, %9 : vector<8x256xf32>
    %cst_5 = arith.constant 1.000000e+00 : f32
    %11 = vector.broadcast %cst_5 : f32 to vector<8x256xf32>
    %12 = arith.subf %11, %4 : vector<8x256xf32>
    %cst_6 = arith.constant 1.000000e+00 : f32
    %13 = vector.broadcast %cst_6 : f32 to vector<8x256xf32>
    %14 = arith.subf %13, %8 : vector<8x256xf32>
    %15 = math.log %14 : vector<8x256xf32>
    %16 = arith.mulf %12, %15 : vector<8x256xf32>
    %17 = arith.addf %10, %16 : vector<8x256xf32>
    %18 = math.roundeven %3 : vector<8x256xf32>
    %c0_7 = arith.constant 0 : index
    %c0_8 = arith.constant 0 : index
    %19 = vector.load %arg6[%c0_7, %c0_8] : memref<8x128xf32, #tpu.memory_space<vmem>>, vector<8x128xf32>
    %20 = arith.mulf %18, %4 : vector<8x256xf32>
    %21 = vector.extract_strided_slice %20 {offsets = [0, 0], sizes = [8, 128], strides = [1, 1]} : vector<8x256xf32> to vector<8x128xf32>
    %22 = vector.extract_strided_slice %20 {offsets = [0, 128], sizes = [8, 128], strides = [1, 1]} : vector<8x256xf32> to vector<8x128xf32>
    %23 = arith.addf %21, %22 : vector<8x128xf32>
    %24 = arith.addf %19, %23 : vector<8x128xf32>
    %c0_9 = arith.constant 0 : index
    %c0_10 = arith.constant 0 : index
    %25 = vector.load %arg6[%c0_9, %c0_10] : memref<8x128xf32, #tpu.memory_space<vmem>>, vector<8x128xf32>
    tpu.vector_store %arg6[%c0_9, %c0_10], %24 {strides = array<i32>} : memref<8x128xf32, #tpu.memory_space<vmem>>, vector<8x128xf32>,
    %c0_11 = arith.constant 0 : index
    %c0_12 = arith.constant 0 : index
    %26 = vector.load %arg7[%c0_11, %c0_12] : memref<8x128xf32, #tpu.memory_space<vmem>>, vector<8x128xf32>
    %27 = arith.addf %18, %4 : vector<8x256xf32>
    %28 = vector.extract_strided_slice %27 {offsets = [0, 0], sizes = [8, 128], strides = [1, 1]} : vector<8x256xf32> to vector<8x128xf32>
    %29 = vector.extract_strided_slice %27 {offsets = [0, 128], sizes = [8, 128], strides = [1, 1]} : vector<8x256xf32> to vector<8x128xf32>
    %30 = arith.addf %28, %29 : vector<8x128xf32>
    %31 = arith.addf %26, %30 : vector<8x128xf32>
    %c0_13 = arith.constant 0 : index
    %c0_14 = arith.constant 0 : index
    %32 = vector.load %arg7[%c0_13, %c0_14] : memref<8x128xf32, #tpu.memory_space<vmem>>, vector<8x128xf32>
    tpu.vector_store %arg7[%c0_13, %c0_14], %31 {strides = array<i32>} : memref<8x128xf32, #tpu.memory_space<vmem>>, vector<8x128xf32>,
    %c0_15 = arith.constant 0 : index
    %c0_16 = arith.constant 0 : index
    %33 = vector.load %arg8[%c0_15, %c0_16] : memref<8x128xf32, #tpu.memory_space<vmem>>, vector<8x128xf32>
    %cst_17 = arith.constant 0.000000e+00 : f32
    %34 = vector.broadcast %cst_17 : f32 to vector<8x256xf32>
    %35 = arith.cmpf one, %4, %34 : vector<8x256xf32>
    %36 = arith.extui %35 : vector<8x256xi1> to vector<8x256xi32>
    %37 = arith.sitofp %36 : vector<8x256xi32> to vector<8x256xf32>
    %38 = vector.extract_strided_slice %37 {offsets = [0, 0], sizes = [8, 128], strides = [1, 1]} : vector<8x256xf32> to vector<8x128xf32>
    %39 = vector.extract_strided_slice %37 {offsets = [0, 128], sizes = [8, 128], strides = [1, 1]} : vector<8x256xf32> to vector<8x128xf32>
    %40 = arith.addf %38, %39 : vector<8x128xf32>
    %41 = arith.addf %33, %40 : vector<8x128xf32>
    %c0_18 = arith.constant 0 : index
    %c0_19 = arith.constant 0 : index
    %42 = vector.load %arg8[%c0_18, %c0_19] : memref<8x128xf32, #tpu.memory_space<vmem>>, vector<8x128xf32>
    tpu.vector_store %arg8[%c0_18, %c0_19], %41 {strides = array<i32>} : memref<8x128xf32, #tpu.memory_space<vmem>>, vector<8x128xf32>,
    %c0_20 = arith.constant 0 : index
    %c0_21 = arith.constant 0 : index
    %43 = vector.load %arg5[%c0_20, %c0_21] : memref<8x128xf32, #tpu.memory_space<vmem>>, vector<8x128xf32>
    %44 = vector.extract_strided_slice %17 {offsets = [0, 0], sizes = [8, 128], strides = [1, 1]} : vector<8x256xf32> to vector<8x128xf32>
    %45 = vector.extract_strided_slice %17 {offsets = [0, 128], sizes = [8, 128], strides = [1, 1]} : vector<8x256xf32> to vector<8x128xf32>
    %46 = arith.addf %44, %45 : vector<8x128xf32>
    %47 = arith.addf %43, %46 : vector<8x128xf32>
    %c0_22 = arith.constant 0 : index
    %c0_23 = arith.constant 0 : index
    %48 = vector.load %arg5[%c0_22, %c0_23] : memref<8x128xf32, #tpu.memory_space<vmem>>, vector<8x128xf32>
    tpu.vector_store %arg5[%c0_22, %c0_23], %47 {strides = array<i32>} : memref<8x128xf32, #tpu.memory_space<vmem>>, vector<8x128xf32>,
    %c0_i32_24 = arith.constant 0 : i32
    %49 = arith.cmpi eq, %arg1, %c0_i32_24 : i32
    %50 = arith.extui %49 : i1 to i32
    %c0_i32_25 = arith.constant 0 : i32
    %51 = arith.cmpi ne, %50, %c0_i32_25 : i32
    scf.if %51 {
      %52 = tpu.iota {dimensions = array<i32: 1>} : vector<8x128xi32>
      %c0_i32_26 = arith.constant 0 : i32
      %53 = vector.broadcast %c0_i32_26 : i32 to vector<8x128xi32>
      %54 = arith.cmpi eq, %52, %53 : vector<8x128xi32>
      %c0_27 = arith.constant 0 : index
      %c0_28 = arith.constant 0 : index
      %55 = vector.load %arg5[%c0_27, %c0_28] : memref<8x128xf32, #tpu.memory_space<vmem>>, vector<8x128xf32>
      %cst_29 = arith.constant dense<0.000000e+00> : vector<8xf32>
      %56 = vector.multi_reduction <add>, %55, %cst_29 [1] : vector<8x128xf32> to vector<8xf32>
      %57 = vector.shape_cast %56 : vector<8xf32> to vector<8x1xf32>
      %cst_30 = arith.constant 0.000000e+00 : f32
      %58 = vector.shape_cast %57 : vector<8x1xf32> to vector<8x1xf32>
      %59 = vector.broadcast %58 : vector<8x1xf32> to vector<8x128xf32>
      %60 = vector.broadcast %cst_30 : f32 to vector<8x128xf32>
      %61 = arith.select %54, %59, %60 : vector<8x128xi1>, vector<8x128xf32>
      %c1_i32 = arith.constant 1 : i32
      %62 = vector.broadcast %c1_i32 : i32 to vector<8x128xi32>
      %63 = arith.cmpi eq, %52, %62 : vector<8x128xi32>
      %c0_31 = arith.constant 0 : index
      %c0_32 = arith.constant 0 : index
      %64 = vector.load %arg6[%c0_31, %c0_32] : memref<8x128xf32, #tpu.memory_space<vmem>>, vector<8x128xf32>
      %cst_33 = arith.constant dense<0.000000e+00> : vector<8xf32>
      %65 = vector.multi_reduction <add>, %64, %cst_33 [1] : vector<8x128xf32> to vector<8xf32>
      %66 = vector.shape_cast %65 : vector<8xf32> to vector<8x1xf32>
      %67 = vector.shape_cast %66 : vector<8x1xf32> to vector<8x1xf32>
      %68 = vector.broadcast %67 : vector<8x1xf32> to vector<8x128xf32>
      %69 = arith.select %63, %68, %61 : vector<8x128xi1>, vector<8x128xf32>
      %c2_i32 = arith.constant 2 : i32
      %70 = vector.broadcast %c2_i32 : i32 to vector<8x128xi32>
      %71 = arith.cmpi eq, %52, %70 : vector<8x128xi32>
      %c0_34 = arith.constant 0 : index
      %c0_35 = arith.constant 0 : index
      %72 = vector.load %arg7[%c0_34, %c0_35] : memref<8x128xf32, #tpu.memory_space<vmem>>, vector<8x128xf32>
      %cst_36 = arith.constant dense<0.000000e+00> : vector<8xf32>
      %73 = vector.multi_reduction <add>, %72, %cst_36 [1] : vector<8x128xf32> to vector<8xf32>
      %74 = vector.shape_cast %73 : vector<8xf32> to vector<8x1xf32>
      %75 = vector.shape_cast %74 : vector<8x1xf32> to vector<8x1xf32>
      %76 = vector.broadcast %75 : vector<8x1xf32> to vector<8x128xf32>
      %77 = arith.select %71, %76, %69 : vector<8x128xi1>, vector<8x128xf32>
      %c3_i32 = arith.constant 3 : i32
      %78 = vector.broadcast %c3_i32 : i32 to vector<8x128xi32>
      %79 = arith.cmpi eq, %52, %78 : vector<8x128xi32>
      %c0_37 = arith.constant 0 : index
      %c0_38 = arith.constant 0 : index
      %80 = vector.load %arg8[%c0_37, %c0_38] : memref<8x128xf32, #tpu.memory_space<vmem>>, vector<8x128xf32>
      %cst_39 = arith.constant dense<0.000000e+00> : vector<8xf32>
      %81 = vector.multi_reduction <add>, %80, %cst_39 [1] : vector<8x128xf32> to vector<8xf32>
      %82 = vector.shape_cast %81 : vector<8xf32> to vector<8x1xf32>
      %83 = vector.shape_cast %82 : vector<8x1xf32> to vector<8x1xf32>
      %84 = vector.broadcast %83 : vector<8x1xf32> to vector<8x128xf32>
      %85 = arith.select %79, %84, %77 : vector<8x128xi1>, vector<8x128xf32>
      %c0_40 = arith.constant 0 : index
      %c0_41 = arith.constant 0 : index
      %86 = vector.load %arg4[%c0_40, %c0_41] : memref<8x128xf32, #tpu.memory_space<vmem>>, vector<8x128xf32>
      tpu.vector_store %arg4[%c0_40, %c0_41], %85 {strides = array<i32>} : memref<8x128xf32, #tpu.memory_space<vmem>>, vector<8x128xf32>,
    } else {
    }
    return
  }
  func.func @transform_0(%arg0: i32, %arg1: i32) -> (i32, i32) {
    %c0_i32 = arith.constant 0 : i32
    return %arg0, %arg1 : i32, i32
  }
  func.func @transform_1(%arg0: i32, %arg1: i32) -> (i32, i32) {
    %c0_i32 = arith.constant 0 : i32
    return %arg0, %arg1 : i32, i32
  }
  func.func @transform_2(%arg0: i32, %arg1: i32) -> (i32, i32) {
    %c0_i32 = arith.constant 0 : i32
    %c0_i32_0 = arith.constant 0 : i32
    return %arg0, %c0_i32 : i32, i32
  }
}

</mosaic_0001>

<bundles_post_ra>
// kernel: squeeze.7
= control target key start
LH: loop header
LB: loop body
LE: loop exit
PB: predicated region body
PF: predicated region fallthrough
CT: control target
= control target key end

     0   :  { %s40_s8 = smov 116   ;;  %vm8_vm0 = vcmask 31744   ;;  %s41_s9 = smov 120   ;;  %s58_s0 = inlined_call_operand.vmem [shape: f32[16], index: 0, kind: input, shape index: {}]   ;;  %s59_s1 = inlined_call_operand.vmem [shape: f32[4,4], index: 1, kind: output, shape index: {}]  }
   0x1   :  { %v5_v0 = vld [vmem:[%s58_s0] sm:$0x1]  ;;  %s39_s0 = smov 124  }
   0x2   :  { %6 = vst [vmem:[#allocation1] sm:$0x1] %v5_v0 }
   0x9   :  { %v10_v1 = vld [vmem:[#allocation1] sm:$0x1]  }
   0xa   :  { %v22_v2 = vld [vmem:[#allocation1] sm:$0x1]   ;;  %11 = vrot.lane.b32.xlu0 %v10_v1, %s39_s0 }
   0xb   :  { %23 = vrot.lane.b32.xlu1 %v22_v2, %s40_s8  ;;  %v7_v3 = vld [vmem:[#allocation1] sm:$0x1]  }
   0xc   :  { %v16_v4 = vld [vmem:[#allocation1] sm:$0x1]   ;;  %9 = vst.msk [vmem:[#allocation0] sm:$0x1] %vm8_vm0, %v7_v3  }
   0xe   :  { %17 = vrot.lane.b32.xlu0 %v16_v4, %s41_s9 }
  0x7c   :  { %v12_v5 = vpop.permute.xlu0 %11  }
  0x7d   :  { %v24_v6 = vpop.permute.xlu1 %23   ;;  %15 = vst.msk [vmem:[#allocation0 + $0x1] sm:$0x1] %vm8_vm0, %v12_v5  }
  0x7e   :  { %27 = vst.msk [vmem:[#allocation0 + $0x3] sm:$0x1] %vm8_vm0, %v24_v6  }
  0x80   :  { %v18_v7 = vpop.permute.xlu0 %17  }
  0x81   :  { %21 = vst.msk [vmem:[#allocation0 + $0x2] sm:$0x1] %vm8_vm0, %v18_v7  }
  0x88   :  { %v32_v8 = vld [vmem:[#allocation0] sm:$0xf] }
  0x89   :  { %35 = vst [vmem:[%s59_s1] sm:$0xf] %v32_v8 }

// kernel: weighted_bce_dice_loss.1
= control target key start
LH: loop header
LB: loop body
LE: loop exit
PB: predicated region body
PF: predicated region fallthrough
CT: control target
= control target key end

     0   :  { %s484_s9 = smov 0   ;;  %s486_s10 = smov 0   ;;  %s524_s0 = inlined_call_operand.vmem [shape: f32[16,256], index: 0, kind: input, shape index: {}]   ;;  %s525_s1 = inlined_call_operand.vmem [shape: f32[16,256], index: 1, kind: input, shape index: {}]   ;;  %s526_s2 = inlined_call_operand.vmem [shape: f32[16,128], index: 2, kind: output, shape index: {}]  }
   0x1   :  { %s488_s11 = smov 0  }
   0x2 LB: > { %s24_s12 = sadd.s32 1, %s462_s10  ;;  %p383_p0 = scmp.ge.s32.totalorder %s466_s11, 1  ;;  %s466_s11 = sphi %s488_s11, %s12_s11   ;;  %s462_s10 = sphi %s486_s10, %s528_s10   ;;  %s458_s9 = sphi %s484_s9, %s527_s9  }
   0x3   : > { %p26_p1 = scmp.ge.s32.totalorder %s24_s12, 2  ;;  %p148_p2 = scmp.lt.s32.totalorder %s466_s11, 3 }
   0x5   : > { %s530_s12 = smov (%p26_p1, %s24_s12), 0  ;;  %p149_p3 = pnand %p383_p0, %p148_p2 }
   0x6   : > { %p183_p4 = scmp.lt.s32.totalorder (!%p149_p3), %s458_s9, 1 }
   0x7   : > { %152 = sbr.rel (%p149_p3) target bundleno = 191 (0xbf), region = 28 }
   0xc   : > { %s532_s9 = smov (!%p183_p4, %s458_s9), 1  ;;  %v468_v26 = vmov 0.0   ;;  %v271_v51 = vlaneseq }
   0xd   : > { %s393_s13 = sshll.u32 %s532_s9, 4  ;;  %s388_s20 = sshll.u32 %s532_s9, 3 }
   0xe   : > { %s190_s16 = scalar_lea.vmem %s524_s0, %s393_s13  ;;  %s200_s19 = scalar_lea.vmem %s525_s1, %s393_s13  ;;  %v272_v52 = vand.u32 127, %v271_v51 }
   0xf   : > { %v214_v0 = vld [vmem:[%s190_s16] sm:$0xff]  ;;  %v215_v1 = vld [vmem:[%s190_s16 + $0x8] sm:$0xff]  ;;  %s205_s23 = scalar_lea.vmem %s526_s2, %s388_s20 }
  0x10   : > { %v218_v2 = vmax.f32 %v214_v0, 1e-07  ;;  %v219_v3 = vmax.f32 %v215_v1, 1e-07  ;;  %v397_v4 = vcvt.f32.s32 %v214_v0  ;;  %v395_v5 = vand.u32 2147483647, %v214_v0 }
  0x11   : > { %v400_v6 = vand.u32 2147483648, %v214_v0  ;;  %v405_v10 = vcvt.f32.s32 %v215_v1  ;;  %v403_v11 = vand.u32 2147483647, %v215_v1  ;;  %v408_v16 = vand.u32 2147483648, %v215_v1  ;;  %v216_v20 = vld [vmem:[%s200_s19] sm:$0xff]  ;;  %v217_v21 = vld [vmem:[%s200_s19 + $0x8] sm:$0xff] }
  0x12   : > { %v220_v7 = vmin.f32 %v218_v2, 0.9999999  ;;  %v221_v8 = vmin.f32 %v219_v3, 0.9999999  ;;  %v398_v9 = vcvt.s32.f32 %v397_v4  ;;  %vm396_vm0 = vcmp.lt.f32.partialorder %v395_v5, 8388608.0 }
  0x13   : > { %v406_v15 = vcvt.s32.f32 %v405_v10  ;;  %vm404_vm1 = vcmp.lt.f32.partialorder %v403_v11, 8388608.0  ;;  %vm255_vm2 = vcmp.ne.f32.partialorder %v216_v20, 0.0  ;;  %vm256_vm3 = vcmp.ne.f32.partialorder %v217_v21, 0.0 }
  0x14   : > { %436 = vlog2.f32 %v220_v7  ;;  %v230_v12 = vsub.f32 1.0, %v220_v7  ;;  %v231_v13 = vsub.f32 1.0, %v221_v8  ;;  %v399_v14 = vand.u32 2147483647, %v398_v9 }
  0x15   : > { %438 = vlog2.f32 %v221_v8  ;;  %v407_v18 = vand.u32 2147483647, %v406_v15  ;;  %v389_v27 = vsel %vm255_vm2, 1.0, %v468_v26  ;;  %v390_v28 = vsel %vm256_vm3, 1.0, %v468_v26 }
  0x16   : > { %440 = vlog2.f32 %v230_v12  ;;  %v401_v17 = vor.u32 %v400_v6, %v399_v14  ;;  %v261_v30 = vadd.f32 %v390_v28, %v389_v27  ;;  %v228_v34 = vsub.f32 1.0, %v216_v20 }
  0x17   : > { %442 = vlog2.f32 %v231_v13  ;;  %v409_v22 = vor.u32 %v408_v16, %v407_v18  ;;  %v229_v37 = vsub.f32 1.0, %v217_v21  ;;  %vm273_vm4 = vcmp.eq.s32.totalorder %v272_v52, 0 }
  0x18   : > { %v402_v19 = vsel %vm396_vm0, %v401_v17, %v214_v0  ;;  %vm278_vm5 = vcmp.eq.s32.totalorder %v272_v52, 1  ;;  %vm283_vm6 = vcmp.eq.s32.totalorder %v272_v52, 2  ;;  %vm288_vm7 = vcmp.eq.s32.totalorder %v272_v52, 3 }
  0x19   : > { %v249_v23 = vadd.f32 %v402_v19, %v216_v20  ;;  %v410_v24 = vsel %vm404_vm1, %v409_v22, %v215_v1  ;;  %v243_v47 = vmul.f32 %v402_v19, %v216_v20 }
  0x1a   : > { %v250_v25 = vadd.f32 %v410_v24, %v217_v21  ;;  %v244_v48 = vmul.f32 %v410_v24, %v217_v21 }
  0x1c   : > { %v251_v29 = vadd.f32 %v250_v25, %v249_v23  ;;  %v245_v50 = vadd.f32 %v244_v48, %v243_v47 }
  0x1e   : > { %285 = vadd.xlane.f32.xlu1 %v251_v29 }
  0x21   : > { %v437_v31 = vpop.eup %436 }
  0x22   : > { %v439_v32 = vpop.eup %438  ;;  %v223_v33 = vmul.f32 0.6931472, %v437_v31  ;;  %290 = vadd.xlane.f32.xlu1 %v261_v30 }
  0x23   : > { %v441_v35 = vpop.eup %440  ;;  %v225_v36 = vmul.f32 0.6931472, %v439_v32 }
  0x24   : > { %v443_v38 = vpop.eup %442  ;;  %v226_v39 = vmul.f32 %v223_v33, %v216_v20  ;;  %v233_v40 = vmul.f32 0.6931472, %v441_v35 }
  0x25   : > { %v227_v41 = vmul.f32 %v225_v36, %v217_v21  ;;  %v235_v42 = vmul.f32 0.6931472, %v443_v38 }
  0x26   : > { %v236_v43 = vmul.f32 %v233_v40, %v228_v34 }
  0x27   : > { %v237_v44 = vmul.f32 %v235_v42, %v229_v37 }
  0x28   : > { %v238_v45 = vadd.f32 %v236_v43, %v226_v39 }
  0x29   : > { %v239_v46 = vadd.f32 %v237_v44, %v227_v41 }
  0x2b   : > { %v265_v49 = vadd.f32 %v239_v46, %v238_v45 }
  0x2d   : > { %275 = vadd.xlane.f32.xlu0 %v265_v49 }
  0x31   : > { %280 = vadd.xlane.f32.xlu0 %v245_v50 }
  0xa7   : > { %v286_v53 = vpop.xlane.xlu1 %285 }
  0xab   : > { %v291_v57 = vpop.xlane.xlu1 %290 }
  0xb6   : > { %v276_v54 = vpop.xlane.xlu0 %275 }
  0xb7   : > { %v277_v55 = vsel %vm273_vm4, %v276_v54, 0.0 }
  0xba   : > { %v281_v56 = vpop.xlane.xlu0 %280 }
  0xbb   : > { %v282_v58 = vsel %vm278_vm5, %v281_v56, %v277_v55 }
  0xbc   : > { %v287_v59 = vsel %vm283_vm6, %v286_v53, %v282_v58 }
  0xbd   : > { %v292_v60 = vsel %vm288_vm7, %v291_v57, %v287_v59 }
  0xbe   : > { %293 = vst [vmem:[%s205_s23] sm:$0xff] %v292_v60 }
  0xbf PF: > { %s12_s11 = sadd.s32 1, %s466_s11   ;;  %s527_s9 = smov %s462_s10 }
  0xc0   : > { %p9_p5 = scmp.ge.s32.totalorder %s12_s11, 4   ;;  %s528_s10 = smov %s530_s12 }
  0xc2   :  { %11 = sbr.rel (!%p9_p5) target bundleno = 2 (0x2), region = 69 }

</bundles_post_ra>
